<compile_context>
chip_gen: v5e
topology: v5e:2x2
jax: 0.10.0
libtpu: 0.0.40
codegen_flags: <defaults>
</compile_context>

<pallas_src>
import jax
import jax.numpy as jnp
from jax.experimental import pallas as pl
from jax.experimental.pallas import tpu as pltpu

BN_EPS = 1e-5


def _fusion_kernel(sx_ref, tx_ref, ws_ref, wt_ref, wf_ref, bn_ref, out_ref):
    """Fused forward: linear -> BN(batch stats) -> relu (x2, shared BN1),
    then concat expressed as a split matmul -> linear -> BN -> relu."""
    F = ws_ref.shape[1]
    OUT = out_ref.shape[1]

    def bn_relu(x, gamma, beta):
        # Training-mode BatchNorm1d, single pass over x:
        # biased var = E[x^2] - mean^2 (clamped >= 0), eps = 1e-5.
        mean = jnp.mean(x, axis=0, keepdims=True)
        meansq = jnp.mean(x * x, axis=0, keepdims=True)
        var = jnp.maximum(meansq - mean * mean, 0.0)
        y = (x - mean) * jax.lax.rsqrt(var + BN_EPS) * gamma + beta
        return jnp.maximum(y, 0.0)

    # Packed BN affine params: row 0 = gamma1, 1 = beta1, 2 = gamma2, 3 = beta2.
    g1 = bn_ref[0:1, :F]
    be1 = bn_ref[1:2, :F]
    g2 = bn_ref[2:3, :OUT]
    be2 = bn_ref[3:4, :OUT]

    # Linear biases omitted: they cancel exactly under training-mode BN.
    s = jnp.dot(sx_ref[...], ws_ref[...], preferred_element_type=jnp.float32)
    s = bn_relu(s, g1, be1)

    t = jnp.dot(tx_ref[...], wt_ref[...], preferred_element_type=jnp.float32)
    t = bn_relu(t, g1, be1)

    # concat([s, t], -1) @ W_f == s @ W_f[:F] + t @ W_f[F:]
    # (static sublane slices of the whole fusion weight — zero-cost views).
    f = (jnp.dot(s, wf_ref[:F, :], preferred_element_type=jnp.float32)
         + jnp.dot(t, wf_ref[F:, :], preferred_element_type=jnp.float32))

    out_ref[...] = bn_relu(f, g2, be2)


def feature_fusion_forward(spatial, temporal, params):
    """spatial: (B, spatial_dim) f32, temporal: (B, temporal_dim) f32."""
    B, S = spatial.shape
    T = temporal.shape[1]
    F = params["w_s"].shape[1]
    OUT = params["w_f"].shape[1]
    maxW = max(F, OUT)

    # Pack the four BN affine vectors into a single small 2-D array.
    bn_pack = jnp.zeros((4, maxW), jnp.float32)
    bn_pack = bn_pack.at[0, :F].set(params["g1"])
    bn_pack = bn_pack.at[1, :F].set(params["be1"])
    bn_pack = bn_pack.at[2, :OUT].set(params["g2"])
    bn_pack = bn_pack.at[3, :OUT].set(params["be2"])

    args = (spatial, temporal, params["w_s"], params["w_t"], params["w_f"],
            bn_pack)

    flops = 2 * B * (S + T) * F + 2 * B * (2 * F) * OUT
    bytes_accessed = 4 * (spatial.size + temporal.size + params["w_s"].size
                          + params["w_t"].size + params["w_f"].size
                          + bn_pack.size + B * OUT)
    transcendentals = 2 * F + OUT  # one rsqrt per feature per BN

    # Small shapes: everything fits in VMEM, single grid point, whole-array
    # blocks (see module docstring for the scaling/tiling plan).
    return pl.pallas_call(
        _fusion_kernel,
        out_shape=jax.ShapeDtypeStruct((B, OUT), jnp.float32),
        in_specs=[pl.BlockSpec(memory_space=pltpu.MemorySpace.VMEM)] * len(args),
        out_specs=pl.BlockSpec(memory_space=pltpu.MemorySpace.VMEM),
        cost_estimate=pl.CostEstimate(flops=flops,
                                      transcendentals=transcendentals,
                                      bytes_accessed=bytes_accessed),
    )(*args)


def init_params(key, spatial_dim, temporal_dim, fusion_dim, output_dim):
    """Deterministic synthetic parameters (PyTorch-like init, stored (in, out))."""
    ks = jax.random.split(key, 6)

    def lin(k, din, dout):
        bound = 1.0 / jnp.sqrt(din)
        kw, kb = jax.random.split(k)
        w = jax.random.uniform(kw, (din, dout), jnp.float32, -bound, bound)
        b = jax.random.uniform(kb, (dout,), jnp.float32, -bound, bound)
        return w, b

    w_s, b_s = lin(ks[0], spatial_dim, fusion_dim)
    w_t, b_t = lin(ks[1], temporal_dim, fusion_dim)
    w_f, b_f = lin(ks[2], 2 * fusion_dim, output_dim)
    # BatchNorm affine params, perturbed deterministically so the test isn't trivial.
    g1 = 1.0 + 0.1 * jax.random.normal(ks[3], (fusion_dim,), jnp.float32)
    be1 = 0.1 * jax.random.normal(ks[4], (fusion_dim,), jnp.float32)
    g2 = jnp.ones((output_dim,), jnp.float32)
    be2 = jnp.zeros((output_dim,), jnp.float32)
    return dict(w_s=w_s, b_s=b_s, w_t=w_t, b_t=b_t, w_f=w_f, b_f=b_f,
                g1=g1, be1=be1, g2=g2, be2=be2)


def _reference(spatial, temporal, params):
    """Pure-JAX reference of the PyTorch forward (training-mode BN),
    WITH the linear biases — proves they cancel under BN."""
    def bn_relu(x, g, b):
        m = jnp.mean(x, axis=0, keepdims=True)
        v = jnp.mean((x - m) ** 2, axis=0, keepdims=True)
        return jnp.maximum((x - m) / jnp.sqrt(v + BN_EPS) * g + b, 0.0)

    s = bn_relu(spatial @ params["w_s"] + params["b_s"], params["g1"], params["be1"])
    t = bn_relu(temporal @ params["w_t"] + params["b_t"], params["g1"], params["be1"])
    c = jnp.concatenate([s, t], axis=-1)
    return bn_relu(c @ params["w_f"] + params["b_f"], params["g2"], params["be2"])


if __name__ == "__main__":
    B, SPATIAL, TEMPORAL, FUSION, OUT = 8, 16, 24, 32, 16

    key = jax.random.PRNGKey(0)
    k_s, k_t, k_p = jax.random.split(key, 3)
    spatial = jax.random.normal(k_s, (B, SPATIAL), jnp.float32)
    temporal = jax.random.normal(k_t, (B, TEMPORAL), jnp.float32)
    params = init_params(k_p, SPATIAL, TEMPORAL, FUSION, OUT)

    out = feature_fusion_forward(spatial, temporal, params)
    out = jax.block_until_ready(out)

    ref = _reference(spatial, temporal, params)
    assert out.shape == (B, OUT)
    assert jnp.allclose(out, ref, atol=1e-4, rtol=1e-4), (
        f"max err {jnp.max(jnp.abs(out - ref))}")

    print("KERNEL_OK")
</pallas_src>

<mosaic_0001>
module attributes {stable_mosaic.version = 11 : i64} {
  func.func @_fusion_kernel(%arg0: memref<8x16xf32, #tpu.memory_space<vmem>>, %arg1: memref<8x24xf32, #tpu.memory_space<vmem>>, %arg2: memref<16x32xf32, #tpu.memory_space<vmem>>, %arg3: memref<24x32xf32, #tpu.memory_space<vmem>>, %arg4: memref<64x16xf32, #tpu.memory_space<vmem>>, %arg5: memref<4x32xf32, #tpu.memory_space<vmem>>, %arg6: memref<8x16xf32, #tpu.memory_space<vmem>>) attributes {dimension_semantics = [], scalar_prefetch = 0 : i64, scratch_operands = 0 : i64, tpu.core_type = #tpu.core_type<tc>} {
    %c0 = arith.constant 0 : index
    %c0_0 = arith.constant 0 : index
    %0 = vector.load %arg5[%c0, %c0_0] : memref<4x32xf32, #tpu.memory_space<vmem>>, vector<1x32xf32>
    %c1 = arith.constant 1 : index
    %c0_1 = arith.constant 0 : index
    %1 = vector.load %arg5[%c1, %c0_1] : memref<4x32xf32, #tpu.memory_space<vmem>>, vector<1x32xf32>
    %c2 = arith.constant 2 : index
    %c0_2 = arith.constant 0 : index
    %2 = vector.load %arg5[%c2, %c0_2] : memref<4x32xf32, #tpu.memory_space<vmem>>, vector<1x16xf32>
    %c3 = arith.constant 3 : index
    %c0_3 = arith.constant 0 : index
    %3 = vector.load %arg5[%c3, %c0_3] : memref<4x32xf32, #tpu.memory_space<vmem>>, vector<1x16xf32>
    %c0_4 = arith.constant 0 : index
    %c0_5 = arith.constant 0 : index
    %4 = vector.load %arg0[%c0_4, %c0_5] : memref<8x16xf32, #tpu.memory_space<vmem>>, vector<8x16xf32>
    %c0_6 = arith.constant 0 : index
    %c0_7 = arith.constant 0 : index
    %5 = vector.load %arg2[%c0_6, %c0_7] : memref<16x32xf32, #tpu.memory_space<vmem>>, vector<16x32xf32>
    %cst = arith.constant dense<0.000000e+00> : vector<8x32xf32>
    %6 = tpu.matmul %4, %5, %cst {dimension_numbers = #tpu.dot_dimension_numbers<[1], [0], [0], [1], [0, 0, 1, 1], [], []>} : vector<8x16xf32>, vector<16x32xf32>, vector<8x32xf32> -> vector<8x32xf32>
    %cst_8 = arith.constant dense<0.000000e+00> : vector<32xf32>
    %7 = vector.multi_reduction <add>, %6, %cst_8 [0] : vector<8x32xf32> to vector<32xf32>
    %8 = vector.shape_cast %7 : vector<32xf32> to vector<1x32xf32>
    %cst_9 = arith.constant 8.000000e+00 : f32
    %9 = vector.broadcast %cst_9 : f32 to vector<1x32xf32>
    %10 = arith.divf %8, %9 : vector<1x32xf32>
    %11 = arith.mulf %6, %6 : vector<8x32xf32>
    %cst_10 = arith.constant dense<0.000000e+00> : vector<32xf32>
    %12 = vector.multi_reduction <add>, %11, %cst_10 [0] : vector<8x32xf32> to vector<32xf32>
    %13 = vector.shape_cast %12 : vector<32xf32> to vector<1x32xf32>
    %cst_11 = arith.constant 8.000000e+00 : f32
    %14 = vector.broadcast %cst_11 : f32 to vector<1x32xf32>
    %15 = arith.divf %13, %14 : vector<1x32xf32>
    %16 = arith.mulf %10, %10 : vector<1x32xf32>
    %17 = arith.subf %15, %16 : vector<1x32xf32>
    %cst_12 = arith.constant 0.000000e+00 : f32
    %18 = vector.broadcast %cst_12 : f32 to vector<1x32xf32>
    %19 = arith.maximumf %17, %18 : vector<1x32xf32>
    %20 = vector.broadcast %10 : vector<1x32xf32> to vector<8x32xf32>
    %21 = arith.subf %6, %20 : vector<8x32xf32>
    %cst_13 = arith.constant 9.99999974E-6 : f32
    %22 = vector.broadcast %cst_13 : f32 to vector<1x32xf32>
    %23 = arith.addf %19, %22 : vector<1x32xf32>
    %24 = math.rsqrt %23 : vector<1x32xf32>
    %25 = vector.broadcast %24 : vector<1x32xf32> to vector<8x32xf32>
    %26 = arith.mulf %21, %25 : vector<8x32xf32>
    %27 = vector.broadcast %0 : vector<1x32xf32> to vector<8x32xf32>
    %28 = arith.mulf %26, %27 : vector<8x32xf32>
    %29 = vector.broadcast %1 : vector<1x32xf32> to vector<8x32xf32>
    %30 = arith.addf %28, %29 : vector<8x32xf32>
    %cst_14 = arith.constant 0.000000e+00 : f32
    %31 = vector.broadcast %cst_14 : f32 to vector<8x32xf32>
    %32 = arith.maximumf %30, %31 : vector<8x32xf32>
    %c0_15 = arith.constant 0 : index
    %c0_16 = arith.constant 0 : index
    %33 = vector.load %arg1[%c0_15, %c0_16] : memref<8x24xf32, #tpu.memory_space<vmem>>, vector<8x24xf32>
    %c0_17 = arith.constant 0 : index
    %c0_18 = arith.constant 0 : index
    %34 = vector.load %arg3[%c0_17, %c0_18] : memref<24x32xf32, #tpu.memory_space<vmem>>, vector<24x32xf32>
    %cst_19 = arith.constant dense<0.000000e+00> : vector<8x32xf32>
    %35 = tpu.matmul %33, %34, %cst_19 {dimension_numbers = #tpu.dot_dimension_numbers<[1], [0], [0], [1], [0, 0, 1, 1], [], []>} : vector<8x24xf32>, vector<24x32xf32>, vector<8x32xf32> -> vector<8x32xf32>
    %cst_20 = arith.constant dense<0.000000e+00> : vector<32xf32>
    %36 = vector.multi_reduction <add>, %35, %cst_20 [0] : vector<8x32xf32> to vector<32xf32>
    %37 = vector.shape_cast %36 : vector<32xf32> to vector<1x32xf32>
    %cst_21 = arith.constant 8.000000e+00 : f32
    %38 = vector.broadcast %cst_21 : f32 to vector<1x32xf32>
    %39 = arith.divf %37, %38 : vector<1x32xf32>
    %40 = arith.mulf %35, %35 : vector<8x32xf32>
    %cst_22 = arith.constant dense<0.000000e+00> : vector<32xf32>
    %41 = vector.multi_reduction <add>, %40, %cst_22 [0] : vector<8x32xf32> to vector<32xf32>
    %42 = vector.shape_cast %41 : vector<32xf32> to vector<1x32xf32>
    %cst_23 = arith.constant 8.000000e+00 : f32
    %43 = vector.broadcast %cst_23 : f32 to vector<1x32xf32>
    %44 = arith.divf %42, %43 : vector<1x32xf32>
    %45 = arith.mulf %39, %39 : vector<1x32xf32>
    %46 = arith.subf %44, %45 : vector<1x32xf32>
    %cst_24 = arith.constant 0.000000e+00 : f32
    %47 = vector.broadcast %cst_24 : f32 to vector<1x32xf32>
    %48 = arith.maximumf %46, %47 : vector<1x32xf32>
    %49 = vector.broadcast %39 : vector<1x32xf32> to vector<8x32xf32>
    %50 = arith.subf %35, %49 : vector<8x32xf32>
    %cst_25 = arith.constant 9.99999974E-6 : f32
    %51 = vector.broadcast %cst_25 : f32 to vector<1x32xf32>
    %52 = arith.addf %48, %51 : vector<1x32xf32>
    %53 = math.rsqrt %52 : vector<1x32xf32>
    %54 = vector.broadcast %53 : vector<1x32xf32> to vector<8x32xf32>
    %55 = arith.mulf %50, %54 : vector<8x32xf32>
    %56 = vector.broadcast %0 : vector<1x32xf32> to vector<8x32xf32>
    %57 = arith.mulf %55, %56 : vector<8x32xf32>
    %58 = vector.broadcast %1 : vector<1x32xf32> to vector<8x32xf32>
    %59 = arith.addf %57, %58 : vector<8x32xf32>
    %cst_26 = arith.constant 0.000000e+00 : f32
    %60 = vector.broadcast %cst_26 : f32 to vector<8x32xf32>
    %61 = arith.maximumf %59, %60 : vector<8x32xf32>
    %c0_27 = arith.constant 0 : index
    %c0_28 = arith.constant 0 : index
    %62 = vector.load %arg4[%c0_27, %c0_28] : memref<64x16xf32, #tpu.memory_space<vmem>>, vector<32x16xf32>
    %cst_29 = arith.constant dense<0.000000e+00> : vector<8x16xf32>
    %63 = tpu.matmul %32, %62, %cst_29 {dimension_numbers = #tpu.dot_dimension_numbers<[1], [0], [0], [1], [0, 0, 1, 1], [], []>} : vector<8x32xf32>, vector<32x16xf32>, vector<8x16xf32> -> vector<8x16xf32>
    %c32 = arith.constant 32 : index
    %c0_30 = arith.constant 0 : index
    %64 = vector.load %arg4[%c32, %c0_30] : memref<64x16xf32, #tpu.memory_space<vmem>>, vector<32x16xf32>
    %cst_31 = arith.constant dense<0.000000e+00> : vector<8x16xf32>
    %65 = tpu.matmul %61, %64, %cst_31 {dimension_numbers = #tpu.dot_dimension_numbers<[1], [0], [0], [1], [0, 0, 1, 1], [], []>} : vector<8x32xf32>, vector<32x16xf32>, vector<8x16xf32> -> vector<8x16xf32>
    %66 = arith.addf %63, %65 : vector<8x16xf32>
    %cst_32 = arith.constant dense<0.000000e+00> : vector<16xf32>
    %67 = vector.multi_reduction <add>, %66, %cst_32 [0] : vector<8x16xf32> to vector<16xf32>
    %68 = vector.shape_cast %67 : vector<16xf32> to vector<1x16xf32>
    %cst_33 = arith.constant 8.000000e+00 : f32
    %69 = vector.broadcast %cst_33 : f32 to vector<1x16xf32>
    %70 = arith.divf %68, %69 : vector<1x16xf32>
    %71 = arith.mulf %66, %66 : vector<8x16xf32>
    %cst_34 = arith.constant dense<0.000000e+00> : vector<16xf32>
    %72 = vector.multi_reduction <add>, %71, %cst_34 [0] : vector<8x16xf32> to vector<16xf32>
    %73 = vector.shape_cast %72 : vector<16xf32> to vector<1x16xf32>
    %cst_35 = arith.constant 8.000000e+00 : f32
    %74 = vector.broadcast %cst_35 : f32 to vector<1x16xf32>
    %75 = arith.divf %73, %74 : vector<1x16xf32>
    %76 = arith.mulf %70, %70 : vector<1x16xf32>
    %77 = arith.subf %75, %76 : vector<1x16xf32>
    %cst_36 = arith.constant 0.000000e+00 : f32
    %78 = vector.broadcast %cst_36 : f32 to vector<1x16xf32>
    %79 = arith.maximumf %77, %78 : vector<1x16xf32>
    %80 = vector.broadcast %70 : vector<1x16xf32> to vector<8x16xf32>
    %81 = arith.subf %66, %80 : vector<8x16xf32>
    %cst_37 = arith.constant 9.99999974E-6 : f32
    %82 = vector.broadcast %cst_37 : f32 to vector<1x16xf32>
    %83 = arith.addf %79, %82 : vector<1x16xf32>
    %84 = math.rsqrt %83 : vector<1x16xf32>
    %85 = vector.broadcast %84 : vector<1x16xf32> to vector<8x16xf32>
    %86 = arith.mulf %81, %85 : vector<8x16xf32>
    %87 = vector.broadcast %2 : vector<1x16xf32> to vector<8x16xf32>
    %88 = arith.mulf %86, %87 : vector<8x16xf32>
    %89 = vector.broadcast %3 : vector<1x16xf32> to vector<8x16xf32>
    %90 = arith.addf %88, %89 : vector<8x16xf32>
    %cst_38 = arith.constant 0.000000e+00 : f32
    %91 = vector.broadcast %cst_38 : f32 to vector<8x16xf32>
    %92 = arith.maximumf %90, %91 : vector<8x16xf32>
    %c0_39 = arith.constant 0 : index
    %c0_40 = arith.constant 0 : index
    %93 = vector.load %arg6[%c0_39, %c0_40] : memref<8x16xf32, #tpu.memory_space<vmem>>, vector<8x16xf32>
    tpu.vector_store %arg6[%c0_39, %c0_40], %92 {strides = array<i32>} : memref<8x16xf32, #tpu.memory_space<vmem>>, vector<8x16xf32>,
    return
  }
}

</mosaic_0001>

<bundles_post_ra>
// kernel: tpu_custom_call.1
= control target key start
LH: loop header
LB: loop body
LE: loop exit
PB: predicated region body
PF: predicated region fallthrough
CT: control target
= control target key end

     0   :  { %vm31_vm0 = vcmask 130048   ;;  %vm105_vm1 = vcmask 195584   ;;  %s445_s0 = inlined_call_operand.vmem [shape: f32[8,16], index: 0, kind: input, shape index: {}]   ;;  %s446_s1 = inlined_call_operand.vmem [shape: f32[8,24], index: 1, kind: input, shape index: {}]   ;;  %s447_s2 = inlined_call_operand.vmem [shape: f32[16,32], index: 2, kind: input, shape index: {}]   ;;  %s448_s3 = inlined_call_operand.vmem [shape: f32[24,32], index: 3, kind: input, shape index: {}]   ;;  %s449_s4 = inlined_call_operand.vmem [shape: f32[64,16], index: 4, kind: input, shape index: {}]   ;;  %s450_s5 = inlined_call_operand.vmem [shape: f32[4,32], index: 5, kind: input, shape index: {}]   ;;  %s451_s6 = inlined_call_operand.hbm [shape: f32[8,16], index: 6, kind: output, shape index: {}]  }
   0x1   :  { %v30_v0 = vld [vmem:[%s447_s2 + $0x8] sm:$0xff]  ;;  %v104_v1 = vld [vmem:[%s448_s3 + $0x10] sm:$0xff]  ;;  %v29_v2 = vld [vmem:[%s447_s2] sm:$0xff] }
   0x2   :  { %49 = vmatpush.msra.mxu0 %v30_v0  ;;  %122 = vmatpush.msra.mxu1 %v104_v1  ;;  %v103_v3 = vld [vmem:[%s448_s3 + $0x8] sm:$0xff]  ;;  %v28_v4 = vld [vmem:[%s445_s0] sm:$0xff] }
   0x3   :  { %v102_v5 = vld [vmem:[%s448_s3] sm:$0xff] }
   0x4   :  { %v101_v6 = vld [vmem:[%s446_s1] sm:$0xff]  ;;  %50 = vmatpush.msra.mxu0 %v29_v2  ;;  %123 = vmatpush.msra.mxu1 %v103_v3 }
   0x5   :  { %11 = vsyncpa [#allocation3], 0  ;;  %274 = vmatmul.msk.f32.vlgmr.msra.gmra.mxu0 %vm31_vm0, %v28_v4  ;;  %v318_v7 = vmov 8.0   ;;  %vm55_vm2 = vcmask 261120   ;;  %v168_v38 = vld [vmem:[%s449_s4 + $0x18] sm:$0xff]  ;;  %v167_v44 = vld [vmem:[%s449_s4 + $0x10] sm:$0xff] }
   0x6   :  { %124 = vmatpush.msra.mxu1 %v102_v5  ;;  %284 = vrcp.f32 %v318_v7  ;;  %211 = vmatpush.msra.mxu3 %v168_v38  ;;  %v172_v43 = vld [vmem:[%s449_s4 + $0x38] sm:$0xff]  ;;  %v171_v49 = vld [vmem:[%s449_s4 + $0x30] sm:$0xff]  ;;  %v166_v50 = vld [vmem:[%s449_s4 + $0x8] sm:$0xff]  ;;  %s319_s30 = smov [#allocation2]   ;;  %s265_s10 = sshll.u32 %s451_s6, 4  ;;  %s266_s10 = int_to_ptr.hbm [resolvable:$true] %s265_s10 }
   0x7   :  { %275 = vmatmul.msk.f32.vlgmr.msra.gmra.mxu1 %vm105_vm1, %v101_v6  ;;  %188 = vmatpush.msra.mxu2 %v172_v43  ;;  %v170_v51 = vld [vmem:[%s449_s4 + $0x28] sm:$0xff]  ;;  %v165_v55 = vld [vmem:[%s449_s4] sm:$0xff]  ;;  %s263_s7 = sshll.u32 %s319_s30, 4  ;;  %s264_s7 = int_to_ptr.vmem [resolvable:$true] %s263_s7 }
   0x8   :  { %212 = vmatpush.msra.mxu3 %v167_v44  ;;  %v169_v59 = vld [vmem:[%s449_s4 + $0x20] sm:$0xff] }
   0x9   :  { %189 = vmatpush.msra.mxu2 %v171_v49 }
   0xa   :  { %213 = vmatpush.msra.mxu3 %v166_v50 }
   0xb   :  { %190 = vmatpush.msra.mxu2 %v170_v51 }
   0xc   :  { %v285_v8 = vpop.eup %284  ;;  %214 = vmatpush.msra.mxu3 %v165_v55 }
   0xd   :  { %v64_v9 = vmul.f32 8.0, %v285_v8  ;;  %vm68_vm3 = vweird.f32 %v285_v8  ;;  %191 = vmatpush.msra.mxu2 %v169_v59 }
   0xf   :  { %v65_v10 = vsub.f32 1.0, %v64_v9 }
  0x11   :  { %v66_v16 = vmul.f32 %v285_v8, %v65_v10 }
  0x13   :  { %v67_v28 = vadd.f32 %v285_v8, %v66_v16 }
  0x15   :  { %v391_v37 = vsel %vm68_vm3, %v285_v8, %v67_v28 }
  0x82   :  { %v377_v11 = vpop.f32.mrf.mxu0 }
  0x83   :  { %v56_v12 = vsel %vm55_vm2, %v377_v11, 0.0  ;;  %v71_v13 = vmul.f32 %v377_v11, %v377_v11 }
  0x84   :  { %v57_v14 = vrot.slane %v56_v12, 4  ;;  %v383_v15 = vpop.f32.mrf.mxu1 }
  0x85   :  { %v72_v17 = vsel %vm55_vm2, %v71_v13, 0.0  ;;  %v129_v18 = vsel %vm55_vm2, %v383_v15, 0.0  ;;  %v137_v19 = vmul.f32 %v383_v15, %v383_v15 }
  0x86   :  { %v58_v20 = vadd.f32 %v57_v14, %v56_v12  ;;  %v73_v21 = vrot.slane %v72_v17, 4  ;;  %v130_v22 = vrot.slane %v129_v18, 4  ;;  %v280_v14 = vld [vmem:[%s450_s5] ss:$0 sm:$0xff] }
  0x87   :  { %v138_v23 = vsel %vm55_vm2, %v137_v19, 0.0 }
  0x88   :  { %v59_v24 = vrot.slane %v58_v20, 2  ;;  %v74_v25 = vadd.f32 %v73_v21, %v72_v17  ;;  %v131_v26 = vadd.f32 %v130_v22, %v129_v18  ;;  %v139_v27 = vrot.slane %v138_v23, 4 }
  0x8a   :  { %v60_v29 = vadd.f32 %v59_v24, %v58_v20  ;;  %v75_v30 = vrot.slane %v74_v25, 2  ;;  %v132_v31 = vrot.slane %v131_v26, 2  ;;  %v140_v32 = vadd.f32 %v139_v27, %v138_v23  ;;  %v281_v20 = vld [vmem:[%s450_s5 + $0x1] ss:$0 sm:$0xff] }
  0x8c   :  { %v61_v33 = vrot.slane %v60_v29, 1  ;;  %v76_v34 = vadd.f32 %v75_v30, %v74_v25  ;;  %v133_v35 = vadd.f32 %v132_v31, %v131_v26  ;;  %v141_v36 = vrot.slane %v140_v32, 2 }
  0x8e   :  { %v62_v39 = vadd.f32 %v61_v33, %v60_v29  ;;  %v77_v40 = vrot.slane %v76_v34, 1  ;;  %v134_v41 = vrot.slane %v133_v35, 1  ;;  %v142_v42 = vadd.f32 %v141_v36, %v140_v32 }
  0x90   :  { %v70_v45 = vmul.f32 %v391_v37, %v62_v39  ;;  %v78_v46 = vadd.f32 %v77_v40, %v76_v34  ;;  %v135_v47 = vadd.f32 %v134_v41, %v133_v35  ;;  %v143_v48 = vrot.slane %v142_v42, 1 }
  0x92   :  { %v79_v52 = vmul.f32 %v78_v46, %v391_v37  ;;  %v80_v53 = vmul.f32 %v70_v45, %v70_v45  ;;  %v136_v54 = vmul.f32 %v135_v47, %v391_v37  ;;  %v144_v56 = vadd.f32 %v143_v48, %v142_v42 }
  0x93   :  { %v83_v13 = vsub.f32 %v377_v11, %v70_v45 }
  0x94   :  { %v81_v57 = vsub.f32 %v79_v52, %v80_v53  ;;  %v146_v58 = vmul.f32 %v136_v54, %v136_v54  ;;  %v145_v60 = vmul.f32 %v144_v56, %v391_v37  ;;  %v149_v21 = vsub.f32 %v383_v15, %v136_v54 }
  0x96   :  { %v82_v61 = vmax.f32 %v81_v57, 0.0  ;;  %v147_v62 = vsub.f32 %v145_v60, %v146_v58  ;;  %v282_v60 = vld [vmem:[%s450_s5 + $0x2] ss:$0 sm:$0xff] }
  0x98   :  { %v84_v63 = vadd.f32 1e-05, %v82_v61  ;;  %v148_v0 = vmax.f32 %v147_v62, 0.0  ;;  %v283_v62 = vld [vmem:[%s450_s5 + $0x3] ss:$0 sm:$0xff] }
  0x9a   :  { %286 = vrsqrt.f32 %v84_v63  ;;  %v150_v1 = vadd.f32 1e-05, %v148_v0  ;;  %vm91_vm5 = vweird.f32 %v84_v63 }
  0x9c   :  { %288 = vrsqrt.f32 %v150_v1  ;;  %vm157_vm8 = vweird.f32 %v150_v1 }
  0xa0   :  { %v287_v2 = vpop.eup %286 }
  0xa1   :  { %v86_v3 = vmul.f32 %v287_v2, %v84_v63  ;;  %vm92_vm4 = vweird.f32 %v287_v2 }
  0xa2   :  { %v289_v4 = vpop.eup %288  ;;  %vm93_vm6 = vmor %vm91_vm5, %vm92_vm4 }
  0xa3   :  { %v87_v5 = vmul.f32 %v287_v2, %v86_v3  ;;  %v152_v6 = vmul.f32 %v289_v4, %v150_v1  ;;  %vm158_vm7 = vweird.f32 %v289_v4 }
  0xa4   :  { %vm159_vm9 = vmor %vm157_vm8, %vm158_vm7 }
  0xa5   :  { %v88_v7 = vmul.f32 0.5, %v87_v5  ;;  %v153_v8 = vmul.f32 %v289_v4, %v152_v6 }
  0xa7   :  { %v89_v9 = vsub.f32 1.5, %v88_v7  ;;  %v154_v10 = vmul.f32 0.5, %v153_v8 }
  0xa9   :  { %v90_v12 = vmul.f32 %v287_v2, %v89_v9  ;;  %v155_v16 = vsub.f32 1.5, %v154_v10 }
  0xab   :  { %v94_v17 = vsel %vm93_vm6, %v287_v2, %v90_v12  ;;  %v156_v19 = vmul.f32 %v289_v4, %v155_v16 }
  0xac   :  { %v95_v18 = vmul.f32 %v94_v17, %v83_v13 }
  0xad   :  { %v160_v11 = vsel %vm159_vm9, %v289_v4, %v156_v19 }
  0xae   :  { %v97_v22 = vmul.f32 %v280_v14, %v95_v18  ;;  %v161_v23 = vmul.f32 %v160_v11, %v149_v21 }
  0xb0   :  { %v99_v24 = vadd.f32 %v281_v20, %v97_v22  ;;  %v162_v25 = vmul.f32 %v280_v14, %v161_v23 }
  0xb2   :  { %v100_v26 = vmax.f32 %v99_v24, 0.0  ;;  %v163_v27 = vadd.f32 %v281_v20, %v162_v25 }
  0xb4   :  { %277 = vmatmul.msk.f32.vlgmr.msra.gmra.mxu3 %vm55_vm2, %v100_v26  ;;  %v164_v28 = vmax.f32 %v163_v27, 0.0 }
  0xb6   :  { %276 = vmatmul.msk.f32.vlgmr.msra.gmra.mxu2 %vm55_vm2, %v164_v28 }
 0x137   :  { %v216_v29 = vpop.f32.mrf.mxu3 }
 0x139   :  { %v193_v30 = vpop.f32.mrf.mxu2 }
 0x13a   :  { %v217_v31 = vadd.f32 %v216_v29, %v193_v30 }
 0x13c   :  { %v219_v32 = vsel %vm31_vm0, %v217_v31, 0.0  ;;  %v227_v33 = vmul.f32 %v217_v31, %v217_v31 }
 0x13d   :  { %v220_v15 = vrot.slane %v219_v32, 4 }
 0x13e   :  { %v228_v34 = vsel %vm31_vm0, %v227_v33, 0.0 }
 0x13f   :  { %v221_v35 = vadd.f32 %v220_v15, %v219_v32  ;;  %v229_v36 = vrot.slane %v228_v34, 4 }
 0x141   :  { %v222_v38 = vrot.slane %v221_v35, 2  ;;  %v230_v39 = vadd.f32 %v229_v36, %v228_v34 }
 0x143   :  { %v223_v40 = vadd.f32 %v222_v38, %v221_v35  ;;  %v231_v41 = vrot.slane %v230_v39, 2 }
 0x145   :  { %v224_v42 = vrot.slane %v223_v40, 1  ;;  %v232_v43 = vadd.f32 %v231_v41, %v230_v39 }
 0x147   :  { %v225_v44 = vadd.f32 %v224_v42, %v223_v40  ;;  %v233_v45 = vrot.slane %v232_v43, 1 }
 0x149   :  { %v226_v46 = vmul.f32 %v225_v44, %v391_v37  ;;  %v234_v47 = vadd.f32 %v233_v45, %v232_v43 }
 0x14b   :  { %v235_v48 = vmul.f32 %v234_v47, %v391_v37  ;;  %v236_v49 = vmul.f32 %v226_v46, %v226_v46  ;;  %v239_v59 = vsub.f32 %v217_v31, %v226_v46 }
 0x14d   :  { %v237_v50 = vsub.f32 %v235_v48, %v236_v49 }
 0x14f   :  { %v238_v51 = vmax.f32 %v237_v50, 0.0 }
 0x151   :  { %v240_v52 = vadd.f32 1e-05, %v238_v51 }
 0x153   :  { %290 = vrsqrt.f32 %v240_v52  ;;  %vm247_vm11 = vweird.f32 %v240_v52 }
 0x159   :  { %v291_v53 = vpop.eup %290 }
 0x15a   :  { %v242_v54 = vmul.f32 %v291_v53, %v240_v52  ;;  %vm248_vm10 = vweird.f32 %v291_v53 }
 0x15b   :  { %vm249_vm12 = vmor %vm247_vm11, %vm248_vm10 }
 0x15c   :  { %v243_v55 = vmul.f32 %v291_v53, %v242_v54 }
 0x15e   :  { %v244_v56 = vmul.f32 0.5, %v243_v55 }
 0x160   :  { %v245_v57 = vsub.f32 1.5, %v244_v56 }
 0x162   :  { %v246_v58 = vmul.f32 %v291_v53, %v245_v57 }
 0x164   :  { %v250_v37 = vsel %vm249_vm12, %v291_v53, %v246_v58 }
 0x165   :  { %v251_v61 = vmul.f32 %v250_v37, %v239_v59 }
 0x167   :  { %v253_v63 = vmul.f32 %v282_v60, %v251_v61 }
 0x169   :  { %v255_v0 = vadd.f32 %v283_v62, %v253_v63 }
 0x16b   :  { %v256_v1 = vmax.f32 %v255_v0, 0.0 }
 0x16d   :  { %257 = vst.msk [vmem:[#allocation2] sm:$0xff] %vm31_vm0, %v256_v1 }
 0x16e   :  { %268 = dma.vmem_to_hbm [thread:$0]  %s264_s7, 128, %s266_s10, [#allocation3]  }
 0x16f   :  { %316 = dma.done.wait [#allocation3], 128  }
 0x170   :  { %317 = vsyncadd [#allocation3], 4294967168 }
 0x171   :  { %273 = vsyncpa [#allocation3], 1 }

</bundles_post_ra>
